<compile_context>
chip_gen: v6e
topology: v6e:2x2x1
jax: 0.10.0
libtpu: 0.0.40
codegen_flags: <defaults>
</compile_context>

<pallas_src>
import jax
import jax.numpy as jnp
from jax.experimental import pallas as pl
from jax.experimental.pallas import tpu as pltpu


def _round_up(n, m):
    return ((n + m - 1) // m) * m


def _choose_row_tile(rows, d, itemsize, n_batch):
    """Pick a sublane-aligned row tile that is VMEM-safe and megacore-friendly."""
    if rows <= 8:
        return rows  # block dim == full rows dim -> always legal
    # ~6 MiB per (tn, D) tile: double-buffered input + output tiles (4 copies)
    # stay ~24 MiB, comfortable on v7x's 64 MiB VMEM and tiny on v5e/v6e.
    tile_budget = 6 << 20
    tn = max(8, ((tile_budget // max(1, d * itemsize)) // 8) * 8)
    tn = min(tn, _round_up(rows, 8))
    # v7x has 2 TensorCores; a single-tile "parallel" grid would idle one.
    if n_batch * pl.cdiv(rows, tn) < 2:
        tn = max(8, _round_up(pl.cdiv(rows, 2), 8))
    return int(tn)


def _drop_path_kernel(scale_ref, x_ref, o_ref):
    # scale_ref: (B,) f32 in SMEM (scalar prefetch); x_ref/o_ref: (1, tn, D).
    b = pl.program_id(0)
    o_ref[...] = (x_ref[...] * scale_ref[b]).astype(o_ref.dtype)


def _drop_path_scale_pallas(x3, scale):
    """out[b, r, :] = x3[b, r, :] * scale[b] via a tiled Pallas kernel."""
    B, rows, D = x3.shape
    itemsize = jnp.dtype(x3.dtype).itemsize
    tn = _choose_row_tile(rows, D, itemsize, B)
    n_row_tiles = pl.cdiv(rows, tn)

    # Double-buffered input tile + double-buffered output tile (scale is SMEM).
    needed = 4 * tn * D * itemsize
    vmem_limit = int(min(max(int(needed * 1.25) + (1 << 20), 16 << 20), 64 << 20))

    cost = pl.CostEstimate(
        flops=B * rows * D,                                   # one mul / element
        transcendentals=0,
        bytes_accessed=2 * B * rows * D * itemsize + B * 4,
    )

    return pl.pallas_call(
        _drop_path_kernel,
        out_shape=jax.ShapeDtypeStruct((B, rows, D), x3.dtype),
        grid_spec=pltpu.PrefetchScalarGridSpec(
            num_scalar_prefetch=1,                            # (B,) scale -> SMEM
            grid=(B, n_row_tiles),
            in_specs=[pl.BlockSpec((1, tn, D), lambda b, j, scale: (b, j, 0))],
            out_specs=pl.BlockSpec((1, tn, D), lambda b, j, scale: (b, j, 0)),
        ),
        compiler_params=pltpu.CompilerParams(
            dimension_semantics=("parallel", "parallel"),
            vmem_limit_bytes=vmem_limit,
        ),
        cost_estimate=cost,
    )(scale, x3)


def drop_path_pallas(x, drop_prob=0.0, training=False, *, key=None,
                     min_pallas_bytes=1 << 20):
    """Pallas TPU DropPath (stochastic depth), forward semantics of the PyTorch module."""
    if drop_prob is None or drop_prob == 0.0 or not training:
        return x  # identity -> matches the PyTorch early return exactly

    if key is None:
        # TODO(synk): deterministic default key; callers should pass a fresh key per step.
        key = jax.random.PRNGKey(0)

    assert x.ndim >= 2, "DropPath is applied to (B, ...) tensors with at least 2 dims"
    keep_prob = 1.0 - drop_prob
    B = x.shape[0]

    # torch.rand -> U[0,1); floor(keep_prob + u) is a {0,1} Bernoulli(keep_prob) mask.
    u = jax.random.uniform(key, (B,), dtype=jnp.float32)
    mask = jnp.floor(keep_prob + u)
    scale = mask / jnp.float32(keep_prob)                     # (B,) f32: 0 or 1/keep_prob

    # Small-input fallback: fixed custom-call / pipeline overhead dominates tiny
    # tensors and XLA fuses a broadcast multiply for free.
    if x.size * jnp.dtype(x.dtype).itemsize < min_pallas_bytes:
        bshape = (B,) + (1,) * (x.ndim - 1)
        return (x.astype(jnp.float32) * scale.reshape(bshape)).astype(x.dtype)

    D = x.shape[-1]
    rows = x.size // (B * D)
    out3 = _drop_path_scale_pallas(x.reshape(B, rows, D), scale)
    return out3.reshape(x.shape)


def drop_path_ref(x, drop_prob=0.0, training=False, *, key=None):
    """Pure-JAX reference mirroring the PyTorch drop_path exactly."""
    if drop_prob is None or drop_prob == 0.0 or not training:
        return x
    if key is None:
        key = jax.random.PRNGKey(0)
    keep_prob = 1.0 - drop_prob
    shape = (x.shape[0],) + (1,) * (x.ndim - 1)
    u = jax.random.uniform(key, (x.shape[0],), dtype=jnp.float32)
    random_tensor = jnp.floor(keep_prob + u).reshape(shape).astype(x.dtype)
    return x / keep_prob * random_tensor


if __name__ == "__main__":
    key = jax.random.PRNGKey(0)
    kx, kd = jax.random.split(key)

    # ViT-style small shape: batch=2, seq=8, embed_dim=128 (lane-dense last dim).
    B, N, D = 2, 8, 128
    x = jax.random.normal(kx, (B, N, D), dtype=jnp.float32)
    drop_prob = 0.25

    # Training path: force the Pallas kernel even at this tiny demo size.
    out = drop_path_pallas(x, drop_prob, training=True, key=kd, min_pallas_bytes=0)
    out = jax.block_until_ready(out)
    ref = drop_path_ref(x, drop_prob, training=True, key=kd)
    assert out.shape == x.shape, out.shape
    assert jnp.allclose(out, ref, atol=1e-5, rtol=1e-5), float(
        jnp.max(jnp.abs(out - ref))
    )

    # Small-input fallback path (default threshold) must agree too.
    out_fb = drop_path_pallas(x, drop_prob, training=True, key=kd)
    out_fb = jax.block_until_ready(out_fb)
    assert jnp.allclose(out_fb, ref, atol=1e-5, rtol=1e-5)

    # Ragged row count (not a multiple of 8) exercises partial-tile masking.
    x2 = jax.random.normal(kx, (2, 13, 128), dtype=jnp.float32)
    out2 = drop_path_pallas(x2, drop_prob, training=True, key=kd, min_pallas_bytes=0)
    out2 = jax.block_until_ready(out2)
    ref2 = drop_path_ref(x2, drop_prob, training=True, key=kd)
    assert jnp.allclose(out2, ref2, atol=1e-5, rtol=1e-5)

    # Eval / drop_prob=0 path -> identity, matching the PyTorch early return.
    assert jnp.array_equal(drop_path_pallas(x, drop_prob, training=False, key=kd), x)
    assert jnp.array_equal(drop_path_pallas(x, 0.0, training=True, key=kd), x)

    print("KERNEL_OK")
</pallas_src>

<mosaic_0001>
module attributes {stable_mosaic.version = 11 : i64} {
  func.func @_drop_path_kernel(%arg0: i32, %arg1: i32, %arg2: memref<2xf32, #tpu.memory_space<smem>>, %arg3: memref<1x8x128xf32, #tpu.memory_space<vmem>>, %arg4: memref<1x8x128xf32, #tpu.memory_space<vmem>>) attributes {dimension_semantics = [#tpu.dimension_semantics<parallel>, #tpu.dimension_semantics<parallel>], iteration_bounds = array<i64: 2, 1>, scalar_prefetch = 1 : i64, scratch_operands = 0 : i64, tpu.core_type = #tpu.core_type<tc>, window_params = [{transform_indices = @transform_0, window_bounds = array<i64: 1, 8, 128>}, {transform_indices = @transform_1, window_bounds = array<i64: 1, 8, 128>}]} {
    %c0 = arith.constant 0 : index
    %c0_0 = arith.constant 0 : index
    %c0_1 = arith.constant 0 : index
    %0 = vector.load %arg3[%c0, %c0_0, %c0_1] : memref<1x8x128xf32, #tpu.memory_space<vmem>>, vector<1x8x128xf32>
    %1 = arith.index_cast %arg0 : i32 to index
    %2 = memref.load %arg2[%1] : memref<2xf32, #tpu.memory_space<smem>>
    %3 = vector.broadcast %2 : f32 to vector<1x8x128xf32>
    %4 = arith.mulf %0, %3 : vector<1x8x128xf32>
    %c0_2 = arith.constant 0 : index
    %c0_3 = arith.constant 0 : index
    %c0_4 = arith.constant 0 : index
    %5 = vector.load %arg4[%c0_2, %c0_3, %c0_4] : memref<1x8x128xf32, #tpu.memory_space<vmem>>, vector<1x8x128xf32>
    tpu.vector_store %arg4[%c0_2, %c0_3, %c0_4], %4 {strides = array<i32>} : memref<1x8x128xf32, #tpu.memory_space<vmem>>, vector<1x8x128xf32>,
    return
  }
  func.func @transform_0(%arg0: i32, %arg1: i32, %arg2: memref<2xf32, #tpu.memory_space<smem>>) -> (i32, i32, i32) {
    %c0_i32 = arith.constant 0 : i32
    %c0_i32_0 = arith.constant 0 : i32
    return %arg0, %arg1, %c0_i32 : i32, i32, i32
  }
  func.func @transform_1(%arg0: i32, %arg1: i32, %arg2: memref<2xf32, #tpu.memory_space<smem>>) -> (i32, i32, i32) {
    %c0_i32 = arith.constant 0 : i32
    %c0_i32_0 = arith.constant 0 : i32
    return %arg0, %arg1, %c0_i32 : i32, i32, i32
  }
}

</mosaic_0001>

<bundles_post_ra>
// kernel: tpu_custom_call.1
= control target key start
LH: loop header
LB: loop body
LE: loop exit
PB: predicated region body
PF: predicated region fallthrough
CT: control target
= control target key end

     0   :  { %s450_s9 = smov [#allocation3]   ;;  %s606_s0 = inlined_call_operand.hbm [shape: f32[2], index: 0, kind: input, shape index: {}]   ;;  %s607_s1 = inlined_call_operand.hbm [shape: f32[2,8,128], index: 1, kind: input, shape index: {}]   ;;  %s608_s2 = inlined_call_operand.hbm [shape: f32[2,8,128], index: 2, kind: output, shape index: {}]  }
   0x1   :  { %8 = dma.hbm_to_smem %s606_s0, 16, %s450_s9, [#allocation2] }
   0x2   :  { %416 = dma.done.wait [#allocation2], 16 }
   0x3   :  { %417 = vsyncadd [#allocation2], 4294967280 }
   0x4   :  { %10 = sfence }
   0x5   :  { %11 = vsyncpa [#allocation5], 0 }
   0x6   :  { %13 = vsyncpa [#allocation5 + $0x1], 0 }
   0x7   :  { %14 = vsyncpa [#allocation6], 0 }
   0x8   :  { %16 = vsyncpa [#allocation6 + $0x1], 0  ;;  %s471_s12 = smov 0   ;;  %s473_s13 = smov 0  }
   0x9   :  { %s475_s14 = smov 0   ;;  %s477_s15 = smov 0  }
   0xa   :  { %s479_s16 = smov 0   ;;  %s481_s17 = smov 0  }
   0xb LB: > { %s254_s0 = sadd.s32 4294967295, %s448_s17   ;;  %s255_s18 = sadd.s32 4294967294, %s448_s17   ;;  %s448_s17 = sphi %s481_s17, %s22_s17   ;;  %s444_s16 = sphi %s479_s16, %s620_s16   ;;  %s440_s15 = sphi %s477_s15, %s619_s15   ;;  %s436_s14 = sphi %s475_s14, %s618_s14   ;;  %s432_s13 = sphi %s473_s13, %s617_s13   ;;  %s428_s12 = sphi %s471_s12, %s616_s12  }
   0xc   : > { %s34_s19 = sadd.s32 1, %s444_s16  ;;  %s43_s20 = sadd.s32 1, %s436_s14 }
   0xd   : > { %p36_p0 = scmp.ge.s32.totalorder %s34_s19, 2  ;;  %p50_p1 = scmp.ne.s32.totalorder %s436_s14, %s432_s13 }
   0xe   : > { %p51_p2 = scmp.eq.s32.totalorder %s448_s17, 0  ;;  %p56_p3 = scmp.ne.s32.totalorder %s432_s13, %s428_s12 }
   0xf   : > { %s622_s19 = smov (%p36_p0, %s34_s19), 0  ;;  %p57_p5 = scmp.eq.s32.totalorder %s254_s0, 0 }
  0x10   : > { %p512_p4 = por %p51_p2, %p50_p1  ;;  %s38_s22 = ssub.s32 %s444_s16, %s622_s19 }
  0x11   : > { %p82_p6 = scmp.eq.s32.totalorder %s254_s0, 1  ;;  %p41_p7 = scmp.eq.s32.totalorder %s38_s22, 0 }
  0x12   : > { %p518_p8 = por %p57_p5, %p56_p3  ;;  %p88_p10 = scmp.eq.s32.totalorder %s255_s18, 1 }
  0x13   : > { %p522_p9 = por %p82_p6, %p50_p1  ;;  %p279_p13 = scmp.lt.s32.totalorder %s448_s17, 2 }
  0x14   : > { %s527_s25 = scalar_select %p41_p7, %s436_s14, %s43_s20  }
  0x15   : > { %p529_p11 = por %p88_p10, %p56_p3  ;;  %s108_s27 = sand.u32 1, %s436_s14  }
  0x16   : > { %s258_s28 = sshll.u32 %s108_s27, 3  ;;  %s259_s29 = sshll.u32 %s444_s16, 7 }
  0x17   : > { %s612_s26 = scalar_select %p529_p11, 1, 0 }
  0x18   : > { %s118_s4 = scalar_lea.hbm %s607_s1, %s259_s29  ;;  %s112_s5 = scalar_lea.vmem [#allocation4], %s258_s28 }
  0x19   : > { %s120_s6 = sshll.u32 %s112_s5, 4  ;;  %p542_p0 = pnand %p279_p13, %p512_p4  ;;  %s121_s6 = int_to_ptr.vmem [resolvable:$true] %s120_s6 }
  0x1a   : > { %p260_p1 = scmp.ge.s32.totalorder %s448_s17, 1  ;;  %p125_p2 = scmp.lt.s32.totalorder %s448_s17, 3 }
  0x1b   : > { %s109_s8 = scalar_lea.sflag [#allocation5], %s108_s27  ;;  %p340_p3 = pneg %p542_p0 }
  0x1c   : > { %s351_s9 = scalar_lea.vmem %s121_s6, 128  ;;  %s451_s10 = smov [#allocation4]  }
  0x1d   : > { %p352_p5 = scmp.ne.s32.totalorder %s121_s6, %s351_s9  ;;  %s356_s11 = sshll.u32 %s451_s10, 4  ;;  %s357_s11 = int_to_ptr.vmem [resolvable:$false] %s356_s11 }
  0x1e   : > { %s358_s0 = scalar_lea.vmem %s357_s11, 256  ;;  %p359_p10 = scmp.lt.s32.totalorder %s121_s6, %s357_s11 }
  0x1f   : > { %p354_p6 = pnand %p352_p5, %p340_p3  ;;  %p360_p12 = scmp.lt.s32.totalorder %s358_s0, %s351_s9 }
  0x21   : > { %p355_p7 = pneg %p354_p6  ;;  %p361_p4 = por %p360_p12, %p359_p10 }
  0x23   : > { %p362_p13 = pnand %p361_p4, %p355_p7 }
  0x25   : > { %365 = shalt.err (!%p362_p13)
}
  0x26   : > { %274 = dma.hbm_to_vmem [thread:$0]  (!%p542_p0), %s118_s4, 128, %s121_s6, %s109_s8  }
  0x27   : > { %p126_p11 = pnand %p260_p1, %p125_p2 }
  0x28   : > { %s557_s18 = sand.u32 (!%p126_p11), 1, %s432_s13  }
  0x29   : > { %129 = sbr.rel (%p126_p11) target bundleno = 71 (0x47), region = 24  ;;  %s261_s20 = sshll.u32 (!%p126_p11), %s557_s18, 3 }
  0x2a   : > { %s132_s21 = scalar_lea.sflag (!%p126_p11), [#allocation5], %s557_s18  ;;  %s135_s22 = scalar_lea.vmem (!%p126_p11), [#allocation4], %s261_s20 }
  0x2e   : > { %419 = dma.done.wait (%p518_p8), %s132_s21, 128  }
  0x2f   : > { %421 = vsyncadd (%p518_p8), %s132_s21, 4294967168  ;;  %s155_s27 = sld [smem:[#allocation3 + %s440_s15]]  ;;  %s153_s28 = scalar_lea.vmem [#allocation7], %s261_s20  ;;  %v154_v0 = vld [vmem:[%s135_s22] sm:$0xff] }
  0x30   : > { %s174_s29 = sshll.u32 %s153_s28, 4  ;;  %s264_s30 = sshll.u32 %s440_s15, 7  ;;  %s175_s29 = int_to_ptr.vmem [resolvable:$true] %s174_s29 }
  0x31   : > { %s172_s5 = scalar_lea.hbm %s608_s2, %s264_s30  ;;  %s160_s6 = scalar_lea.sflag [#allocation6], %s557_s18 }
  0x32   : > { %s366_s23 = scalar_lea.vmem %s175_s29, 128  ;;  %s452_s7 = smov [#allocation7]  }
  0x33   : > { %p367_p8 = scmp.ne.s32.totalorder %s175_s29, %s366_s23  ;;  %s370_s8 = sshll.u32 %s452_s7, 4  ;;  %s371_s8 = int_to_ptr.vmem [resolvable:$false] %s370_s8 }
  0x34   : > { %s372_s9 = scalar_lea.vmem %s371_s8, 256  ;;  %p373_p0 = scmp.lt.s32.totalorder %s175_s29, %s371_s8 }
  0x35   : > { %v156_v1 = vstv %s155_s27  ;;  %p368_p11 = pnand %p367_p8, %p522_p9  ;;  %p374_p1 = scmp.lt.s32.totalorder %s372_s9, %s366_s23 }
  0x36   : > { %v157_v2 = vmul.f32 %v156_v1, %v154_v0 }
  0x37   : > { %p369_p12 = pneg %p368_p11  ;;  %p375_p2 = por %p374_p1, %p373_p0 }
  0x38   : > { %158 = vst [vmem:[%s153_s28] sm:$0xff] %v157_v2 }
  0x39   : > { %p376_p3 = pnand %p375_p2, %p369_p12 }
  0x3b   : > { %379 = shalt.err (!%p376_p3)
}
  0x3c   : > { %s380_s15 = scalar_lea.hbm %s172_s5, 128  ;;  %s384_s0 = scalar_lea.hbm %s608_s2, 256 }
  0x3d   : > { %p381_p5 = scmp.ne.s32.totalorder %s172_s5, %s380_s15  ;;  %p385_p10 = scmp.lt.s32.totalorder %s172_s5, %s608_s2 }
  0x3e   : > { %p386_p4 = scmp.lt.s32.totalorder %s384_s0, %s380_s15 }
  0x3f   : > { %p382_p6 = pnand %p381_p5, %p522_p9 }
  0x40   : > { %p387_p13 = por %p386_p4, %p385_p10 }
  0x41   : > { %p383_p7 = pneg %p382_p6 }
  0x43   : > { %p388_p8 = pnand %p387_p13, %p383_p7 }
  0x45   : > { %391 = shalt.err (!%p388_p8)
}
  0x46   : > { %269 = dma.vmem_to_hbm [thread:$0]  (%p522_p9), %s175_s29, 128, %s172_s5, %s160_s6  }
  0x47 PF: > { %s186_s21 = sand.u32 1, %s428_s12   ;;  %p614_p11 = scmp.ne.s32.totalorder %s612_s26, 0 }
  0x48   : > { %p615_p12 = scmp.ge.s32.totalorder %s448_s17, 2  ;;  %s187_s22 = scalar_lea.sflag [#allocation6], %s186_s21 }
  0x4a   : > { %p276_p0 = pnand %p615_p12, %p614_p11 }
  0x4c   : > { %p277_p1 = pneg %p276_p0 }
  0x4e   : > { %423 = dma.done.wait (%p277_p1), %s187_s22, 128  }
  0x4f   : > { %425 = vsyncadd (%p277_p1), %s187_s22, 4294967168  ;;  %s22_s17 = sadd.s32 1, %s448_s17   ;;  %s616_s12 = smov %s432_s13 }
  0x50   : > { %p19_p2 = scmp.ge.s32.totalorder %s22_s17, 4   ;;  %s617_s13 = smov %s436_s14 }
  0x51   : > { %s618_s14 = smov %s527_s25  ;;  %s619_s15 = smov %s444_s16 }
  0x52   : > { %s620_s16 = smov %s622_s19  ;;  %21 = sbr.rel (!%p19_p2) target bundleno = 11 (0xb), region = 69 }
  0x57   :  { %192 = vsyncpa [#allocation5], 1 }
  0x58   :  { %194 = vsyncpa [#allocation5 + $0x1], 1 }
  0x59   :  { %195 = vsyncpa [#allocation6], 1 }
  0x5a   :  { %197 = vsyncpa [#allocation6 + $0x1], 1 }

</bundles_post_ra>
